<compile_context>
chip_gen: v5e
topology: v5e:2x2
jax: 0.10.0
libtpu: 0.0.40
codegen_flags: <defaults>
</compile_context>

<pallas_src>
import functools

import jax
import jax.numpy as jnp
from jax.experimental import pallas as pl
from jax.experimental.pallas import tpu as pltpu


def _round_up(v, m):
    return ((v + m - 1) // m) * m


# ---------------------------------------------------------------------------
# Kernels
# ---------------------------------------------------------------------------
def _gap_full_k_kernel(x_ref, o_ref, *, inv_count):
    """Single-K-block path: one tile holds the full (C, H*W) of bn images."""
    x = x_ref[...].astype(jnp.float32)                 # (bn, C, K)
    o_ref[...] = (jnp.sum(x, axis=-1) * inv_count).astype(o_ref.dtype)


def _gap_tiled_k_kernel(x_ref, o_ref, acc_ref, *, inv_count, k_total, tk):
    """Large-K fallback: grid = (row_tiles, k_tiles), f32 accumulation."""
    k = pl.program_id(1)

    @pl.when(k == 0)
    def _init():
        acc_ref[...] = jnp.zeros_like(acc_ref)

    x = x_ref[...].astype(jnp.float32)                 # (bn, C, TK)
    if k_total % tk != 0:
        # Ragged tail block: lanes past the true reduction length contain
        # unspecified data; zero them (sum-neutral).  Trace-time branch.
        col = jax.lax.broadcasted_iota(jnp.int32, x.shape, 2) + k * tk
        x = jnp.where(col < k_total, x, 0.0)
    acc_ref[...] += jnp.sum(x, axis=-1)                # lane-dense (bn, C) acc

    @pl.when(k == pl.num_programs(1) - 1)
    def _finalize():
        o_ref[...] = (acc_ref[...] * inv_count).astype(o_ref.dtype)


# ---------------------------------------------------------------------------
# Tile selection
# ---------------------------------------------------------------------------
def _choose_tiles(N, C, K, itemsize, budget_bytes):
    """Returns (bn, tk). tk is None when the full K fits in one block."""
    c_pad = _round_up(C, 8)          # sublane padding of the VMEM tile
    k_pad = _round_up(K, 128)        # lane padding of the VMEM tile
    per_item_full_k = c_pad * k_pad * itemsize
    bn_min = N if N < 8 else 8       # output block's 2nd-to-last dim: mult of 8 or == N

    if bn_min * per_item_full_k <= budget_bytes:
        # Common CNN-head case: whole reduction in one block, scale bn up so
        # each tile moves ~budget bytes.
        bn_max = budget_bytes // per_item_full_k
        if N <= bn_max:
            bn = N
        else:
            bn = max(8, (bn_max // 8) * 8)
        return bn, None

    # Large-K fallback: tile K in multiples of 128 (no padding of the array).
    bn = bn_min
    per_lane_chunk = bn * c_pad * 128 * itemsize
    tk = 128 * max(1, budget_bytes // per_lane_chunk)
    return bn, tk


# ---------------------------------------------------------------------------
# Wrapper
# ---------------------------------------------------------------------------
def global_avg_pool_flatten(x: jax.Array, *, vmem_budget_bytes: int = 4 << 20) -> jax.Array:
    """AdaptiveAvgPool2d(1) + flatten: (N, C, H, W) -> (N, C)."""
    N, C, H, W = x.shape
    K = H * W
    if x.size == 0:
        # TODO(synk): PyTorch AdaptiveAvgPool2d on an empty spatial extent
        # would produce NaN/error; we return zeros for empty inputs.
        return jnp.zeros((N, C), dtype=x.dtype)

    x3d = x.reshape(N, C, K)                     # contiguous, free reshape
    bn, tk = _choose_tiles(N, C, K, x.dtype.itemsize, vmem_budget_bytes)
    inv_count = 1.0 / float(K)

    if tk is None:
        # Single-K-block path: 1-D grid over batch row tiles, no accumulator.
        return pl.pallas_call(
            functools.partial(_gap_full_k_kernel, inv_count=inv_count),
            out_shape=jax.ShapeDtypeStruct((N, C), x.dtype),
            grid_spec=pltpu.PrefetchScalarGridSpec(
                num_scalar_prefetch=0,
                grid=(pl.cdiv(N, bn),),
                in_specs=[pl.BlockSpec((bn, C, K), lambda i: (i, 0, 0))],
                out_specs=pl.BlockSpec((bn, C), lambda i: (i, 0)),
            ),
            compiler_params=pltpu.CompilerParams(
                dimension_semantics=("parallel",),
            ),
        )(x3d)

    # Large-K fallback: 2-D grid (rows parallel, reduction arbitrary).
    return pl.pallas_call(
        functools.partial(_gap_tiled_k_kernel, inv_count=inv_count,
                          k_total=K, tk=tk),
        out_shape=jax.ShapeDtypeStruct((N, C), x.dtype),
        grid_spec=pltpu.PrefetchScalarGridSpec(
            num_scalar_prefetch=0,
            grid=(pl.cdiv(N, bn), pl.cdiv(K, tk)),
            in_specs=[pl.BlockSpec((bn, C, tk), lambda i, k: (i, 0, k))],
            out_specs=pl.BlockSpec((bn, C), lambda i, k: (i, 0)),
            scratch_shapes=[pltpu.VMEM((bn, C), jnp.float32)],
        ),
        compiler_params=pltpu.CompilerParams(
            dimension_semantics=("parallel", "arbitrary"),
        ),
    )(x3d)


def feature_wrapper_forward(x: jax.Array, model_fn=None) -> jax.Array:
    """Equivalent of FeatureWrapper.forward."""
    # TODO(synk): the wrapped `model` is an arbitrary nn.Module feature backbone
    # (e.g. alexnet/vgg `.features`) with no fixed architecture; it is taken as
    # a user-supplied callable (identity here). Only the pool+flatten head is a
    # Pallas kernel.
    if model_fn is not None:
        x = model_fn(x)
    return global_avg_pool_flatten(x)


if __name__ == "__main__":
    key = jax.random.PRNGKey(0)
    # NCHW feature map consistent with the module: batch=2, channels=4, 16x16.
    x = jax.random.normal(key, (2, 4, 16, 16), dtype=jnp.float32)

    y = feature_wrapper_forward(x)          # model = identity in this demo
    y = jax.block_until_ready(y)
    y_ref = jnp.mean(x, axis=(2, 3))
    assert y.shape == (x.shape[0], x.shape[1]), y.shape
    assert y.dtype == x.dtype
    assert jnp.allclose(y, y_ref, atol=1e-5, rtol=1e-5)

    # Also exercise the large-K fallback (tiny forced VMEM budget -> TK < K,
    # reduction grid axis + f32 accumulator + ragged-K-tail masking).
    x2 = jax.random.normal(jax.random.PRNGKey(1), (2, 4, 48, 48), dtype=jnp.float32)
    y2 = jax.block_until_ready(
        global_avg_pool_flatten(x2, vmem_budget_bytes=64 * 1024))
    assert jnp.allclose(y2, jnp.mean(x2, axis=(2, 3)), atol=1e-5, rtol=1e-5)

    print("KERNEL_OK")
</pallas_src>

<mosaic_0001>
module attributes {stable_mosaic.version = 11 : i64} {
  func.func @_gap_full_k_kernel(%arg0: i32, %arg1: memref<2x4x256xf32, #tpu.memory_space<vmem>>, %arg2: memref<2x4xf32, #tpu.memory_space<vmem>>) attributes {dimension_semantics = [#tpu.dimension_semantics<parallel>], iteration_bounds = array<i64: 1>, scalar_prefetch = 0 : i64, scratch_operands = 0 : i64, tpu.core_type = #tpu.core_type<tc>, window_params = [{transform_indices = @transform_0, window_bounds = array<i64: 2, 4, 256>}, {transform_indices = @transform_1, window_bounds = array<i64: 2, 4>}]} {
    %c0 = arith.constant 0 : index
    %c0_0 = arith.constant 0 : index
    %c0_1 = arith.constant 0 : index
    %0 = vector.load %arg1[%c0, %c0_0, %c0_1] : memref<2x4x256xf32, #tpu.memory_space<vmem>>, vector<2x4x256xf32>
    %cst = arith.constant dense<0.000000e+00> : vector<2x4xf32>
    %1 = vector.multi_reduction <add>, %0, %cst [2] : vector<2x4x256xf32> to vector<2x4xf32>
    %cst_2 = arith.constant 3.906250e-03 : f32
    %2 = vector.broadcast %cst_2 : f32 to vector<2x4xf32>
    %3 = arith.mulf %1, %2 : vector<2x4xf32>
    %c0_3 = arith.constant 0 : index
    %c0_4 = arith.constant 0 : index
    %4 = vector.load %arg2[%c0_3, %c0_4] : memref<2x4xf32, #tpu.memory_space<vmem>>, vector<2x4xf32>
    tpu.vector_store %arg2[%c0_3, %c0_4], %3 {strides = array<i32>} : memref<2x4xf32, #tpu.memory_space<vmem>>, vector<2x4xf32>,
    return
  }
  func.func @transform_0(%arg0: i32) -> (i32, i32, i32) {
    %c0_i32 = arith.constant 0 : i32
    %c0_i32_0 = arith.constant 0 : i32
    %c0_i32_1 = arith.constant 0 : i32
    return %arg0, %c0_i32, %c0_i32_0 : i32, i32, i32
  }
  func.func @transform_1(%arg0: i32) -> (i32, i32) {
    %c0_i32 = arith.constant 0 : i32
    %c0_i32_0 = arith.constant 0 : i32
    return %arg0, %c0_i32 : i32, i32
  }
}

</mosaic_0001>

<bundles_post_ra>
// kernel: tpu_custom_call.1
= control target key start
LH: loop header
LB: loop body
LE: loop exit
PB: predicated region body
PF: predicated region fallthrough
CT: control target
= control target key end

     0   :  { %6 = vsyncpa [#allocation3], 0  ;;  %s157_s0 = inlined_call_operand.hbm [shape: f32[2,4,256], index: 0, kind: input, shape index: {}]   ;;  %s158_s1 = inlined_call_operand.hbm [shape: f32[2,4], index: 1, kind: output, shape index: {}]  }
   0x1   :  { %7 = vsyncpa [#allocation4], 0  ;;  %s12_s8 = sshll.u32 %s157_s0, 4  ;;  %s137_s9 = smov [#allocation2]   ;;  %s13_s8 = int_to_ptr.hbm [resolvable:$true] %s12_s8 }
   0x2   :  { %s14_s10 = sshll.u32 %s137_s9, 4  ;;  %s138_s11 = smov 128   ;;  %s15_s10 = int_to_ptr.vmem [resolvable:$true] %s14_s10 }
   0x3   :  { %s139_s12 = smov 8  }
   0x4   :  { %20 = dma.hbm_to_vmem [thread:$0]  %s13_s8, 256, %s15_s10, [#allocation3], %s138_s11, %s138_s11, %s139_s12  }
   0x5   :  { %133 = dma.done.wait [#allocation3], 256  }
   0x6   :  { %134 = vsyncadd [#allocation3], 4294967040  ;;  %v25_v0 = vld [vmem:[#allocation2] sm:$0xff]  ;;  %v26_v1 = vld [vmem:[#allocation2 + $0x8] sm:$0xff]  ;;  %vm40_vm0 = vcmask 1043456   ;;  %v55_v13 = vlaneseq  ;;  %s140_s0 = smov [#allocation5]  }
   0x7   :  { %29 = vst [vmem:[#allocation1] ss:$2 sm:$0xff] %v25_v0  ;;  %s69_s13 = sshll.u32 %s140_s0, 4  ;;  %s71_s16 = sshll.u32 %s158_s1, 4  ;;  %vm59_vm1 = vcmask 1041409   ;;  %vm62_vm2 = vcmask 25600   ;;  %s70_s13 = int_to_ptr.vmem [resolvable:$true] %s69_s13  ;;  %s72_s16 = int_to_ptr.hbm [resolvable:$true] %s71_s16 }
   0x8   :  { %33 = vst [vmem:[#allocation1 + $0x10] ss:$2 sm:$0xff] %v26_v1  ;;  %v56_v14 = vand.u32 127, %v55_v13 }
   0xe   :  { %v30_v2 = vld.sshfl [vmem:[#allocation1] sm:$0xff pattern:$0x75316420]  ;;  %v31_v3 = vld.sshfl [vmem:[#allocation1 + $0x8] sm:$0xff pattern:$0x75316420] }
   0xf   :  { %v41_v4 = vsel %vm40_vm0, %v30_v2, 0.0  ;;  %v42_v5 = vsel %vm40_vm0, %v31_v3, 0.0  ;;  %v34_v7 = vld.sshfl [vmem:[#allocation1 + $0x10] sm:$0xff pattern:$0x75316420] }
  0x10   :  { %v43_v6 = vadd.f32 %v42_v5, %v41_v4  ;;  %v35_v8 = vld.sshfl [vmem:[#allocation1 + $0x18] sm:$0xff pattern:$0x75316420]  ;;  %v46_v9 = vsel %vm40_vm0, %v34_v7, 0.0 }
  0x11   :  { %v47_v10 = vsel %vm40_vm0, %v35_v8, 0.0 }
  0x12   :  { %44 = vadd.xlane.f32.xlu0 %v43_v6  ;;  %v48_v11 = vadd.f32 %v47_v10, %v46_v9 }
  0x1a   :  { %49 = vadd.xlane.f32.xlu0 %v48_v11 }
  0x85   :  { %v45_v12 = vpop.xlane.xlu0 %44 }
  0x86   :  { %v51_v15 = vmul.f32 0.00390625, %v45_v12 }
  0x88   :  { %v57_v18 = vperm.slane %v51_v15, %v56_v14 }
  0x8d   :  { %v50_v16 = vpop.xlane.xlu0 %49 }
  0x8e   :  { %v52_v17 = vmul.f32 0.00390625, %v50_v16 }
  0x90   :  { %v58_v19 = vperm.slane %v52_v17, %v56_v14 }
  0x92   :  { %v60_v20 = vsel %vm59_vm1, %v58_v19, %v57_v18 }
  0x93   :  { %63 = vst.msk [vmem:[#allocation5] sm:$0x3] %vm62_vm2, %v60_v20 }
  0x94   :  { %74 = dma.vmem_to_hbm [thread:$0]  %s70_s13, 32, %s72_s16, [#allocation4]  }
  0x95   :  { %135 = dma.done.wait [#allocation4], 32  }
  0x96   :  { %136 = vsyncadd [#allocation4], 4294967264 }
  0x97   :  { %79 = vsyncpa [#allocation3], 1 }
  0x98   :  { %80 = vsyncpa [#allocation4], 1 }

</bundles_post_ra>
